<compile_context>
chip_gen: v6e
topology: v6e:2x2x1
jax: 0.10.0
libtpu: 0.0.40
codegen_flags: <defaults>
</compile_context>

<pallas_src>
import jax
import jax.numpy as jnp
from jax.experimental import pallas as pl
from jax.experimental.pallas import tpu as pltpu

_LANE = 128                                # vreg lane width
_TN_MAX = 1024                             # target output-tile width (lanes)
_W_TILE_VMEM_BUDGET = 20 * 1024 * 1024     # budget for the double-buffered W tile


def _adaln_kernel(act_ref, w_ref, b_ref, o_ref):
    # silu(c) is precomputed in the wrapper and already cast to the weight
    # dtype, so the body is just one MXU matmul + bias add per weight tile.
    prec = jax.lax.Precision.HIGHEST if w_ref.dtype == jnp.float32 else None
    out = jnp.dot(act_ref[...], w_ref[...],
                  preferred_element_type=jnp.float32, precision=prec)
    o_ref[...] = (out + b_ref[...].astype(jnp.float32)).astype(o_ref.dtype)


def _round_up(x, m):
    return ((x + m - 1) // m) * m


def _pick_tn(out_dim, embed_dim, w_bytes, tn_max):
    """Pick the output tile width (lanes).

    Largest multiple-of-128 tile that (a) fits the double-buffered-W VMEM
    budget, (b) prefers exact divisors of out_dim (no ragged tile, no W pad),
    (c) prefers an even tile count for a balanced v7x 2-TensorCore split.
    """
    n_lane = _round_up(out_dim, _LANE)
    cap = min((tn_max // _LANE) * _LANE, n_lane)
    budget_tn = (_W_TILE_VMEM_BUDGET // (2 * embed_dim * w_bytes)) // _LANE * _LANE
    cap = max(_LANE, min(cap, budget_tn))
    divisors = [t for t in range(_LANE, cap + 1, _LANE) if out_dim % t == 0]
    if divisors:
        best = max(divisors)
        even = [t for t in divisors if (out_dim // t) % 2 == 0]
        if even and 2 * max(even) >= best:
            return max(even)          # balanced 2-core split, tile >= best/2
        return best
    # out_dim not 128-aligned: one ragged last tile (masked boundary stores).
    return cap


def adaln_modulation(c, w, b, *, tn_max=_TN_MAX):
    """silu(c) @ w + b, then unsqueeze(1).

    Args:
      c: (B, embedding_dim) conditioning embedding.
      w: (embedding_dim, 3*target_dim) weight (transpose of nn.Linear.weight).
      b: (3*target_dim,) bias.
    Returns:
      (B, 1, 3*target_dim) modulation parameters (shift, scale, gate).
    """
    B, E = c.shape
    if w.ndim != 2 or w.shape[0] != E:
        raise ValueError(
            "w must be (embedding_dim, 3*target_dim), i.e. the transpose of "
            f"PyTorch nn.Linear.weight; got w.shape={w.shape}, expected first "
            f"dim {E}")
    out_dim = w.shape[1]
    if b.shape != (out_dim,):
        raise ValueError(f"b must have shape ({out_dim},), got {b.shape}")

    # SiLU hoisted out of the per-tile kernel body: tiny (B, E) op vs. the W
    # streaming traffic; cast to the weight dtype so bf16 weights hit the
    # native bf16 MXU path with f32 accumulation.
    c32 = c.astype(jnp.float32)
    act = (c32 * jax.nn.sigmoid(c32)).astype(w.dtype)

    w_bytes = jnp.dtype(w.dtype).itemsize
    act_bytes = jnp.dtype(act.dtype).itemsize
    out_bytes = jnp.dtype(c.dtype).itemsize

    tn = _pick_tn(out_dim, E, w_bytes, tn_max)
    grid_n = pl.cdiv(out_dim, tn)

    b2d = b.reshape(1, out_dim)

    cost = pl.CostEstimate(
        flops=2 * B * E * out_dim,
        transcendentals=0,
        bytes_accessed=(E * out_dim + out_dim) * w_bytes
        + B * E * act_bytes + B * out_dim * out_bytes,
    )

    # Explicit scoped-VMEM limit (v5e default is only 16 MiB). The tile budget
    # keeps this well under v7x's 64 MiB physical VMEM.
    vmem_need = (2 * E * tn * w_bytes + 2 * B * E * act_bytes
                 + 2 * B * tn * out_bytes + 2 * tn * w_bytes)
    vmem_limit = min(max(int(1.5 * vmem_need) + (2 << 20), 32 << 20), 56 << 20)

    params = pl.pallas_call(
        _adaln_kernel,
        out_shape=jax.ShapeDtypeStruct((B, out_dim), c.dtype),
        grid_spec=pltpu.PrefetchScalarGridSpec(
            num_scalar_prefetch=0,
            grid=(grid_n,),
            in_specs=[
                # Small activation block, resident across the whole grid.
                pl.BlockSpec((B, E), lambda j: (0, 0)),
                # Weight streamed tile-by-tile (double-buffered by Pallas).
                pl.BlockSpec((E, tn), lambda j: (0, j)),
                # Matching bias tile.
                pl.BlockSpec((1, tn), lambda j: (0, j)),
            ],
            out_specs=pl.BlockSpec((B, tn), lambda j: (0, j)),
        ),
        compiler_params=pltpu.CompilerParams(
            # Independent output tiles -> megacore-shardable on v7x.
            dimension_semantics=("parallel",),
            vmem_limit_bytes=vmem_limit,
        ),
        cost_estimate=cost,
    )(act, w, b2d)

    # unsqueeze(1) -> (B, 1, 3*target_dim)
    return params[:, None, :]


if __name__ == "__main__":
    # Small shapes consistent with the module: (B, embedding_dim) -> (B, 1, 3*target_dim)
    B, embedding_dim, target_dim = 4, 64, 128
    out_dim = 3 * target_dim  # 384 (lane-aligned, single tile)

    key = jax.random.PRNGKey(0)
    kc, kw, kb = jax.random.split(key, 3)
    c = jax.random.normal(kc, (B, embedding_dim), dtype=jnp.float32)

    # AdaLN-Zero init: zero weight & bias -> identity modulation (all zeros).
    w_zero = jnp.zeros((embedding_dim, out_dim), dtype=jnp.float32)
    b_zero = jnp.zeros((out_dim,), dtype=jnp.float32)
    out0 = jax.block_until_ready(adaln_modulation(c, w_zero, b_zero))
    assert out0.shape == (B, 1, out_dim)
    assert jnp.allclose(out0, 0.0)

    # f32 weights: check kernel math against a pure-JAX reference.
    w_rand = jax.random.normal(kw, (embedding_dim, out_dim), dtype=jnp.float32) * 0.02
    b_rand = jax.random.normal(kb, (out_dim,), dtype=jnp.float32) * 0.02
    got = jax.block_until_ready(adaln_modulation(c, w_rand, b_rand))
    ref = (jnp.dot(jax.nn.silu(c), w_rand,
                   precision=jax.lax.Precision.HIGHEST) + b_rand)[:, None, :]
    assert jnp.allclose(got, ref, atol=1e-5, rtol=1e-5)

    # bf16 weights (production path): native bf16 MXU operands, f32 accumulate.
    w_bf = w_rand.astype(jnp.bfloat16)
    b_bf = b_rand.astype(jnp.bfloat16)
    got_bf = jax.block_until_ready(adaln_modulation(c, w_bf, b_bf))
    act_bf = jax.nn.silu(c).astype(jnp.bfloat16)
    ref_bf = (jnp.dot(act_bf, w_bf, preferred_element_type=jnp.float32)
              + b_bf.astype(jnp.float32))[:, None, :]
    assert jnp.allclose(got_bf, ref_bf, atol=2e-2, rtol=2e-2)

    # Multi-tile path: out_dim=1536 -> tn=768, grid_n=2 (even 2-core split).
    td2 = 512
    w2 = jax.random.normal(kw, (embedding_dim, 3 * td2), dtype=jnp.float32) * 0.02
    b2 = jax.random.normal(kb, (3 * td2,), dtype=jnp.float32) * 0.02
    got2 = jax.block_until_ready(adaln_modulation(c, w2, b2))
    ref2 = (jnp.dot(jax.nn.silu(c), w2,
                    precision=jax.lax.Precision.HIGHEST) + b2)[:, None, :]
    assert jnp.allclose(got2, ref2, atol=1e-5, rtol=1e-5)

    # Ragged path: out_dim=198 (not lane-aligned) -> one ragged tile, masked stores.
    td3 = 66
    w3 = jax.random.normal(kw, (embedding_dim, 3 * td3), dtype=jnp.float32) * 0.02
    b3 = jax.random.normal(kb, (3 * td3,), dtype=jnp.float32) * 0.02
    got3 = jax.block_until_ready(adaln_modulation(c, w3, b3))
    ref3 = (jnp.dot(jax.nn.silu(c), w3,
                    precision=jax.lax.Precision.HIGHEST) + b3)[:, None, :]
    assert jnp.allclose(got3, ref3, atol=1e-5, rtol=1e-5)

    print("KERNEL_OK")
</pallas_src>

<mosaic_0001>
module attributes {stable_mosaic.version = 11 : i64} {
  func.func @_adaln_kernel(%arg0: i32, %arg1: memref<4x64xf32, #tpu.memory_space<vmem>>, %arg2: memref<64x384xf32, #tpu.memory_space<vmem>>, %arg3: memref<1x384xf32, #tpu.memory_space<vmem>>, %arg4: memref<4x384xf32, #tpu.memory_space<vmem>>) attributes {dimension_semantics = [#tpu.dimension_semantics<parallel>], iteration_bounds = array<i64: 1>, scalar_prefetch = 0 : i64, scratch_operands = 0 : i64, tpu.core_type = #tpu.core_type<tc>, window_params = [{pipeline_mode = #tpu.pipeline_mode<synchronous>, transform_indices = @transform_0, window_bounds = array<i64: 4, 64>}, {transform_indices = @transform_1, window_bounds = array<i64: 64, 384>}, {transform_indices = @transform_2, window_bounds = array<i64: 1, 384>}, {transform_indices = @transform_3, window_bounds = array<i64: 4, 384>}]} {
    %c0 = arith.constant 0 : index
    %c0_0 = arith.constant 0 : index
    %0 = vector.load %arg1[%c0, %c0_0] : memref<4x64xf32, #tpu.memory_space<vmem>>, vector<4x64xf32>
    %c0_1 = arith.constant 0 : index
    %c0_2 = arith.constant 0 : index
    %1 = vector.load %arg2[%c0_1, %c0_2] : memref<64x384xf32, #tpu.memory_space<vmem>>, vector<64x384xf32>
    %cst = arith.constant dense<0.000000e+00> : vector<4x384xf32>
    %2 = tpu.matmul %0, %1, %cst {dimension_numbers = #tpu.dot_dimension_numbers<[1], [0], [0], [1], [0, 0, 1, 1], [], []>, precision = #tpu.contract_precision<fp32>} : vector<4x64xf32>, vector<64x384xf32>, vector<4x384xf32> -> vector<4x384xf32>
    %c0_3 = arith.constant 0 : index
    %c0_4 = arith.constant 0 : index
    %3 = vector.load %arg3[%c0_3, %c0_4] : memref<1x384xf32, #tpu.memory_space<vmem>>, vector<1x384xf32>
    %4 = vector.broadcast %3 : vector<1x384xf32> to vector<4x384xf32>
    %5 = arith.addf %2, %4 : vector<4x384xf32>
    %c0_5 = arith.constant 0 : index
    %c0_6 = arith.constant 0 : index
    %6 = vector.load %arg4[%c0_5, %c0_6] : memref<4x384xf32, #tpu.memory_space<vmem>>, vector<4x384xf32>
    tpu.vector_store %arg4[%c0_5, %c0_6], %5 {strides = array<i32>} : memref<4x384xf32, #tpu.memory_space<vmem>>, vector<4x384xf32>,
    return
  }
  func.func @transform_0(%arg0: i32) -> (i32, i32) {
    %c0_i32 = arith.constant 0 : i32
    %c0_i32_0 = arith.constant 0 : i32
    %c0_i32_1 = arith.constant 0 : i32
    return %c0_i32, %c0_i32_0 : i32, i32
  }
  func.func @transform_1(%arg0: i32) -> (i32, i32) {
    %c0_i32 = arith.constant 0 : i32
    %c0_i32_0 = arith.constant 0 : i32
    return %c0_i32, %arg0 : i32, i32
  }
  func.func @transform_2(%arg0: i32) -> (i32, i32) {
    %c0_i32 = arith.constant 0 : i32
    %c0_i32_0 = arith.constant 0 : i32
    return %c0_i32, %arg0 : i32, i32
  }
  func.func @transform_3(%arg0: i32) -> (i32, i32) {
    %c0_i32 = arith.constant 0 : i32
    %c0_i32_0 = arith.constant 0 : i32
    return %c0_i32, %arg0 : i32, i32
  }
}

</mosaic_0001>

<bundles_post_ra>
// kernel: tpu_custom_call.1
= control target key start
LH: loop header
LB: loop body
LE: loop exit
PB: predicated region body
PF: predicated region fallthrough
CT: control target
= control target key end

     0   :  { %8 = vsyncpa [#allocation3], 0  ;;  %s2048_s0 = inlined_call_operand.hbm [shape: f32[4,64], index: 0, kind: input, shape index: {}]   ;;  %s2049_s1 = inlined_call_operand.hbm [shape: f32[64,384], index: 1, kind: input, shape index: {}]   ;;  %s2050_s2 = inlined_call_operand.vmem [shape: f32[1,384], index: 2, kind: input, shape index: {}]   ;;  %s2051_s3 = inlined_call_operand.hbm [shape: f32[4,384], index: 3, kind: output, shape index: {}]  }
   0x1   :  { %9 = vsyncpa [#allocation6], 0 }
   0x2   :  { %10 = vsyncpa [#allocation4], 0  ;;  %s1534_s12 = smov [#allocation2]   ;;  %s1535_s14 = smov [#allocation5]  }
   0x3   :  { %s17_s13 = sshll.u32 %s1534_s12, 4  ;;  %s26_s15 = sshll.u32 %s1535_s14, 4  ;;  %s18_s13 = int_to_ptr.vmem [resolvable:$true] %s17_s13  ;;  %s27_s15 = int_to_ptr.vmem [resolvable:$true] %s26_s15 }
   0x4   :  { %s1476_s16 = scalar_lea.vmem %s18_s13, 64  ;;  %p1481_p1 = scmp.lt.s32.totalorder %s18_s13, %s18_s13 }
   0x5   :  { %p1477_p0 = scmp.ne.s32.totalorder %s18_s13, %s1476_s16  ;;  %p1482_p2 = scmp.lt.s32.totalorder %s1476_s16, %s1476_s16 }
   0x7   :  { %p1483_p3 = por %p1482_p2, %p1481_p1 }
   0x9   :  { %p1484_p4 = pnand %p1483_p3, %p1477_p0 }
   0xb   :  { %1487 = shalt.err (!%p1484_p4)
}
   0xc   :  { %20 = dma.hbm_to_vmem [thread:$0]  %s2048_s0, 64, %s18_s13, [#allocation3]  }
   0xd   :  { %s1496_s19 = scalar_lea.vmem %s27_s15, 3072  ;;  %p1501_p6 = scmp.lt.s32.totalorder %s27_s15, %s27_s15 }
   0xe   :  { %p1497_p5 = scmp.ne.s32.totalorder %s27_s15, %s1496_s19  ;;  %p1502_p7 = scmp.lt.s32.totalorder %s1496_s19, %s1496_s19 }
  0x10   :  { %p1503_p8 = por %p1502_p7, %p1501_p6 }
  0x12   :  { %p1504_p9 = pnand %p1503_p8, %p1497_p5 }
  0x14   :  { %1507 = shalt.err (!%p1504_p9)
}
  0x15   :  { %s1536_s20 = smov 384   ;;  %s1537_s21 = smov 24  }
  0x16   :  { %32 = dma.hbm_to_vmem [thread:$0]  %s2049_s1, 3072, %s27_s15, [#allocation6], %s1536_s20, %s1536_s20, %s1537_s21  }
  0x17   :  { %1528 = dma.done.wait [#allocation3], 64  }
  0x18   :  { %1529 = vsyncadd [#allocation3], 4294967232 }
  0x19   :  { %1530 = dma.done.wait [#allocation6], 3072  }
  0x1a   :  { %1531 = vsyncadd [#allocation6], 4294964224  ;;  %v1538_v0 = vmov 0.0   ;;  %v64_v1 = vld [vmem:[#allocation5 + $0xb0] sm:$0xff]  ;;  %v63_v2 = vld [vmem:[#allocation5 + $0xa8] sm:$0xff]  ;;  %vm83_vm0 = vcmask 523264  }
  0x1b   :  { %167 = vmatprep.mubr.f32.mxu0 %v1538_v0  ;;  %323 = vmatprep.mubr.f32.mxu1 %v1538_v0  ;;  %v61_v3 = vld [vmem:[#allocation5 + $0x98] sm:$0xff]  ;;  %v1569_v4 = vand.u32 4294901760, %v64_v1  ;;  %v1571_v5 = vand.u32 4294901760, %v63_v2  ;;  %v60_v7 = vld [vmem:[#allocation5 + $0x90] sm:$0xff]  ;;  %v58_v8 = vld [vmem:[#allocation5 + $0x80] sm:$0xff]  ;;  %vm1539_vm1 = vmmov 0  }
  0x1c   :  { %v1573_v6 = vand.u32 4294901760, %v61_v3  ;;  %v57_v9 = vld [vmem:[#allocation5 + $0x78] sm:$0xff]  ;;  %v1575_v10 = vand.u32 4294901760, %v60_v7  ;;  %v1577_v11 = vand.u32 4294901760, %v58_v8  ;;  %v55_v13 = vld [vmem:[#allocation5 + $0x68] sm:$0xff]  ;;  %v54_v14 = vld [vmem:[#allocation5 + $0x60] sm:$0xff] }
  0x1d   :  { %v1579_v12 = vand.u32 4294901760, %v57_v9  ;;  %v52_v15 = vld [vmem:[#allocation5 + $0x50] sm:$0xff]  ;;  %104 = vmatprep.subr.mxu0 %v1569_v4  ;;  %v1582_v16 = vand.u32 4294901760, %v55_v13  ;;  %v1584_v17 = vand.u32 4294901760, %v54_v14  ;;  %v1589_v19 = vsub.f32 %v64_v1, %v1569_v4  ;;  %v51_v20 = vld [vmem:[#allocation5 + $0x48] sm:$0xff]  ;;  %v1591_v21 = vld [vmem:[#allocation5 + $0x38] sm:$0xff] }
  0x1e   :  { %v1586_v18 = vand.u32 4294901760, %v52_v15  ;;  %v1593_v22 = vld [vmem:[#allocation5 + $0x30] sm:$0xff]  ;;  %106 = vmatpush1.msra.mxu0 %v1571_v5  ;;  %v1596_v23 = vand.u32 4294901760, %v51_v20  ;;  %v1599_v24 = vsub.f32 %v63_v2, %v1571_v5  ;;  %v1602_v25 = vand.u32 4294901760, %v1591_v21  ;;  %v1607_v27 = vld [vmem:[#allocation5 + $0x20] sm:$0xff]  ;;  %v1609_v28 = vld [vmem:[#allocation5 + $0x18] sm:$0xff] }
  0x1f   :  { %v1605_v26 = vsub.f32 %v61_v3, %v1573_v6  ;;  %v1611_v29 = vld [vmem:[#allocation5 + $0x8] sm:$0xff]  ;;  %108 = vmatprep.subr.mxu0 %v1573_v6  ;;  %v197_v30 = vand.u32 4294901760, %v1589_v19  ;;  %v1616_v31 = vand.u32 4294901760, %v1593_v22  ;;  %v1619_v32 = vsub.f32 %v60_v7, %v1575_v10  ;;  %v1633_v38 = vld [vmem:[#allocation5] sm:$0xff]  ;;  %v41_v51 = vld [vmem:[#allocation2] sm:$0xf] }
  0x20   :  { %v1622_v33 = vand.u32 4294901760, %v1607_v27  ;;  %110 = vmatpush1.msra.mxu0 %v1575_v10  ;;  %v203_v34 = vand.u32 4294901760, %v1599_v24  ;;  %v1628_v36 = vsub.f32 %v58_v8, %v1577_v11  ;;  %v1631_v37 = vand.u32 4294901760, %v1609_v28 }
  0x21   :  { %v209_v35 = vand.u32 4294901760, %v1605_v26  ;;  %112 = vmatprep.subr.mxu0 %v1577_v11  ;;  %v198_v39 = vsub.f32 %v1589_v19, %v197_v30  ;;  %v215_v40 = vand.u32 4294901760, %v1619_v32  ;;  %v1641_v41 = vsub.f32 %v57_v9, %v1579_v12 }
  0x22   :  { %v1644_v42 = vand.u32 4294901760, %v1611_v29  ;;  %114 = vmatpush1.msra.mxu0 %v1579_v12  ;;  %v204_v43 = vsub.f32 %v1599_v24, %v203_v34  ;;  %v221_v45 = vand.u32 4294901760, %v1628_v36  ;;  %v1655_v46 = vsub.f32 %v55_v13, %v1582_v16 }
  0x23   :  { %v210_v44 = vsub.f32 %v1605_v26, %v209_v35  ;;  %116 = vmatprep.subr.mxu0 %v1582_v16  ;;  %v199_v47 = vand.u32 4294901760, %v198_v39  ;;  %v216_v48 = vsub.f32 %v1619_v32, %v215_v40  ;;  %v227_v49 = vand.u32 4294901760, %v1641_v41 }
  0x24   :  { %v1663_v50 = vand.u32 4294901760, %v1633_v38  ;;  %118 = vmatpush1.msra.mxu0 %v1584_v17  ;;  %v205_v52 = vand.u32 4294901760, %v204_v43  ;;  %v222_v54 = vsub.f32 %v1628_v36, %v221_v45  ;;  %v233_v55 = vand.u32 4294901760, %v1655_v46 }
  0x25   :  { %v211_v53 = vand.u32 4294901760, %v210_v44  ;;  %120 = vmatprep.subr.mxu0 %v1586_v18  ;;  %200 = vmatprep.subr.mxu1 %v199_v47  ;;  %v217_v56 = vand.u32 4294901760, %v216_v48  ;;  %v228_v57 = vsub.f32 %v1641_v41, %v227_v49  ;;  %v1675_v58 = vsub.f32 %v54_v14, %v1584_v17 }
  0x26   :  { %v1678_v59 = vsub.f32 %v52_v15, %v1586_v18  ;;  %122 = vmatpush1.msra.mxu0 %v1596_v23  ;;  %206 = vmatpush1.msra.mxu1 %v205_v52  ;;  %v223_v60 = vand.u32 4294901760, %v222_v54  ;;  %v234_v61 = vsub.f32 %v1655_v46, %v233_v55  ;;  %v85_v62 = vsel %vm83_vm0, %v41_v51, 0 }
  0x27   :  { %v1686_v63 = vsub.f32 %v51_v20, %v1596_v23  ;;  %124 = vmatprep.subr.mxu0 %v1602_v25  ;;  %212 = vmatprep.subr.mxu1 %v211_v53  ;;  %v229_v1 = vand.u32 4294901760, %v228_v57  ;;  %v239_v2 = vand.u32 4294901760, %v1675_v58  ;;  %v1691_v7 = vand.u32 4294901760, %v85_v62 }
  0x28   :  { %v245_v3 = vand.u32 4294901760, %v1678_v59  ;;  %126 = vmatpush1.msra.mxu0 %v1616_v31  ;;  %218 = vmatpush1.msra.mxu1 %v217_v56  ;;  %v235_v8 = vand.u32 4294901760, %v234_v61  ;;  %v1697_v13 = vsub.f32 %v1591_v21, %v1602_v25  ;;  %v1701_v14 = vsub.f32 %v1593_v22, %v1616_v31 }
  0x29   :  { %v251_v9 = vand.u32 4294901760, %v1686_v63  ;;  %128 = vmatprep.subr.mxu0 %v1622_v33  ;;  %224 = vmatprep.subr.mxu1 %v223_v60  ;;  %v240_v15 = vsub.f32 %v1675_v58, %v239_v2  ;;  %v1711_v39 = vsub.f32 %v85_v62, %v1691_v7  ;;  %v1721_v44 = vsub.f32 %v1607_v27, %v1622_v33 }
  0x2a   :  { %v246_v20 = vsub.f32 %v1678_v59, %v245_v3  ;;  %130 = vmatpush1.msra.mxu0 %v1631_v37  ;;  %230 = vmatpush1.msra.mxu1 %v229_v1  ;;  %v257_v22 = vand.u32 4294901760, %v1697_v13  ;;  %v263_v43 = vand.u32 4294901760, %v1701_v14  ;;  %v1729_v52 = vsub.f32 %v1609_v28, %v1631_v37 }
  0x2b   :  { %v252_v21 = vsub.f32 %v1686_v63, %v251_v9  ;;  %132 = vmatprep.subr.mxu0 %v1644_v42  ;;  %236 = vmatprep.subr.mxu1 %v235_v8  ;;  %v241_v47 = vand.u32 4294901760, %v240_v15  ;;  %v1725_v51 = vand.u32 4294901760, %v1711_v39  ;;  %v269_v56 = vand.u32 4294901760, %v1721_v44 }
  0x2c   :  { %v247_v48 = vand.u32 4294901760, %v246_v20  ;;  %134 = vmatpush1.msra.mxu0 %v1663_v50  ;;  %v258_v27 = vsub.f32 %v1697_v13, %v257_v22  ;;  %v264_v54 = vsub.f32 %v1701_v14, %v263_v43  ;;  %v275_v57 = vand.u32 4294901760, %v1729_v52 }
  0x2d   :  { %v253_v53 = vand.u32 4294901760, %v252_v21  ;;  %242 = vmatpush1.msra.mxu1 %v241_v47  ;;  %349 = vmatprep.subr.mxu0 %v1589_v19  ;;  %v171_v28 = vsub.f32 %v1711_v39, %v1725_v51  ;;  %v1745_v60 = vsub.f32 %v1611_v29, %v1644_v42  ;;  %v1749_v61 = vsub.f32 %v1633_v38, %v1663_v50  ;;  %v65_v19 = vld [vmem:[#allocation5 + $0xb8] sm:$0xff] }
  0x2e   :  { %248 = vmatprep.subr.mxu1 %v247_v48  ;;  %v259_v62 = vand.u32 4294901760, %v258_v27  ;;  %v265_v1 = vand.u32 4294901760, %v264_v54  ;;  %v270_v8 = vsub.f32 %v1721_v44, %v269_v56  ;;  %v276_v20 = vsub.f32 %v1729_v52, %v275_v57 }
  0x2f   :  { %v1754_v15 = vand.u32 4294901760, %v171_v28  ;;  %254 = vmatpush1.msra.mxu1 %v253_v53  ;;  %v281_v29 = vand.u32 4294901760, %v1745_v60  ;;  %v287_v21 = vand.u32 4294901760, %v1749_v61 }
  0x30   :  { %260 = vmatprep.subr.mxu1 %v259_v62  ;;  %v271_v38 = vand.u32 4294901760, %v270_v8  ;;  %v277_v47 = vand.u32 4294901760, %v276_v20  ;;  %v66_v20 = vld [vmem:[%s2050_s2] sm:$0x7]  ;;  %s1540_s2 = smov [#allocation7]  }
  0x31   :  { %173 = vmatmul.mubr.f32.vlgmr.msra.gmra.mxu0 %v1754_v15  ;;  %266 = vmatpush1.msra.mxu1 %v265_v1  ;;  %v282_v48 = vsub.f32 %v1745_v60, %v281_v29  ;;  %v288_v53 = vsub.f32 %v1749_v61, %v287_v21  ;;  %s1283_s24 = sshll.u32 %s1540_s2, 4  ;;  %s1284_s24 = int_to_ptr.vmem [resolvable:$true] %s1283_s24 }
  0x32   :  { %352 = vmatpush1.msra.mxu0 %v1599_v24  ;;  %272 = vmatprep.subr.mxu1 %v271_v38  ;;  %v62_v24 = vld [vmem:[#allocation5 + $0xa0] sm:$0xff]  ;;  %s1508_s25 = scalar_lea.vmem %s1284_s24, 192  ;;  %p1513_p11 = scmp.lt.s32.totalorder %s1284_s24, %s1284_s24 }
  0x33   :  { %355 = vmatprep.subr.mxu0 %v1605_v26  ;;  %278 = vmatpush1.msra.mxu1 %v277_v47  ;;  %v283_v27 = vand.u32 4294901760, %v282_v48  ;;  %v289_v54 = vand.u32 4294901760, %v288_v53  ;;  %v1820_v26 = vand.u32 4294901760, %v65_v19  ;;  %p1509_p10 = scmp.ne.s32.totalorder %s1284_s24, %s1508_s25  ;;  %p1514_p12 = scmp.lt.s32.totalorder %s1508_s25, %s1508_s25 }
  0x34   :  { %358 = vmatpush1.msra.mxu0 %v1619_v32  ;;  %427 = vmatprep.mubr.f32.mxu0 %v1538_v0  ;;  %v1828_v32 = vand.u32 4294901760, %v62_v24 }
  0x35   :  { %361 = vmatprep.subr.mxu0 %v1628_v36  ;;  %284 = vmatprep.subr.mxu1 %v283_v27  ;;  %v50_v36 = vld [vmem:[#allocation5 + $0x40] sm:$0xff]  ;;  %p1515_p13 = por %p1514_p12, %p1513_p11 }
  0x36   :  { %364 = vmatpush1.msra.mxu0 %v1641_v41  ;;  %290 = vmatpush1.msra.mxu1 %v289_v54 }
  0x37   :  { %367 = vmatprep.subr.mxu0 %v1655_v46  ;;  %325 = vmatmul.mubr.f32.vlgmr.msra.gmra.mxu1 %v1691_v7  ;;  %v1874_v46 = vand.u32 4294901760, %v50_v36  ;;  %p1516_p0 = pnand %p1515_p13, %p1509_p10 }
  0x38   :  { %370 = vmatpush1.msra.mxu0 %v1675_v58  ;;  %453 = vmatprep.subr.mxu1 %v1569_v4 }
  0x39   :  { %373 = vmatprep.subr.mxu0 %v1678_v59  ;;  %455 = vmatpush1.msra.mxu1 %v1571_v5 }
  0x3a   :  { %376 = vmatpush1.msra.mxu0 %v1686_v63  ;;  %457 = vmatprep.subr.mxu1 %v1573_v6 }
  0x3b   :  { %379 = vmatprep.subr.mxu0 %v1697_v13  ;;  %459 = vmatpush1.msra.mxu1 %v1575_v10 }
  0x3c   :  { %382 = vmatpush1.msra.mxu0 %v1701_v14  ;;  %461 = vmatprep.subr.mxu1 %v1577_v11 }
  0x3d   :  { %385 = vmatprep.subr.mxu0 %v1721_v44  ;;  %463 = vmatpush1.msra.mxu1 %v1579_v12 }
  0x3e   :  { %388 = vmatpush1.msra.mxu0 %v1729_v52  ;;  %465 = vmatprep.subr.mxu1 %v1582_v16 }
  0x3f   :  { %391 = vmatprep.subr.mxu0 %v1745_v60  ;;  %467 = vmatpush1.msra.mxu1 %v1584_v17 }
  0x40   :  { %394 = vmatpush1.msra.mxu0 %v1749_v61  ;;  %469 = vmatprep.subr.mxu1 %v1586_v18 }
  0x41   :  { %430 = vmatmul.mubr.f32.vlgmr.msra.gmra.mxu0 %v1711_v39  ;;  %545 = vmatprep.subr.mxu0 %v197_v30  ;;  %v59_v30 = vld [vmem:[#allocation5 + $0x88] sm:$0xff] }
  0x42   :  { %471 = vmatpush1.msra.mxu1 %v1596_v23  ;;  %549 = vmatpush1.msra.mxu0 %v203_v34  ;;  %v56_v34 = vld [vmem:[#allocation5 + $0x70] sm:$0xff] }
  0x43   :  { %473 = vmatprep.subr.mxu1 %v1602_v25  ;;  %553 = vmatprep.subr.mxu0 %v209_v35  ;;  %v1839_v35 = vand.u32 4294901760, %v59_v30 }
  0x44   :  { %475 = vmatpush1.msra.mxu1 %v1616_v31  ;;  %557 = vmatpush1.msra.mxu0 %v215_v40 }
  0x45   :  { %477 = vmatprep.subr.mxu1 %v1622_v33  ;;  %561 = vmatprep.subr.mxu0 %v221_v45  ;;  %v47_v45 = vld [vmem:[#allocation5 + $0x28] sm:$0xff] }
  0x46   :  { %479 = vmatpush1.msra.mxu1 %v1631_v37  ;;  %565 = vmatpush1.msra.mxu0 %v227_v49  ;;  %v44_v49 = vld [vmem:[#allocation5 + $0x10] sm:$0xff] }
  0x47   :  { %481 = vmatprep.subr.mxu1 %v1644_v42  ;;  %569 = vmatprep.subr.mxu0 %v233_v55  ;;  %v1887_v55 = vand.u32 4294901760, %v47_v45  ;;  %v1900_v59 = vand.u32 4294901760, %v44_v49 }
  0x48   :  { %483 = vmatpush1.msra.mxu1 %v1663_v50  ;;  %516 = vmatprep.mubr.f32.mxu1 %v1538_v0 }
  0x49   :  { %573 = vmatpush1.msra.mxu0 %v239_v2  ;;  %520 = vmatmul.mubr.f32.vlgmr.msra.gmra.mxu1 %v1725_v51 }
  0x4a   :  { %577 = vmatprep.subr.mxu0 %v245_v3  ;;  %663 = vmatprep.subr.mxu1 %v1569_v4  ;;  %v1837_v4 = vsub.f32 %v65_v19, %v1820_v26 }
  0x4b   :  { %581 = vmatpush1.msra.mxu0 %v251_v9  ;;  %665 = vmatpush1.msra.mxu1 %v1571_v5  ;;  %v1848_v5 = vsub.f32 %v62_v24, %v1828_v32 }
  0x4c   :  { %585 = vmatprep.subr.mxu0 %v257_v22  ;;  %667 = vmatprep.subr.mxu1 %v1573_v6  ;;  %v1850_v6 = vand.u32 4294901760, %v56_v34 }
  0x4d   :  { %589 = vmatpush1.msra.mxu0 %v263_v43  ;;  %669 = vmatpush1.msra.mxu1 %v1575_v10  ;;  %v53_v10 = vld [vmem:[#allocation5 + $0x58] sm:$0xff]  ;;  %v843_v41 = vand.u32 4294901760, %v1848_v5 }
  0x4e   :  { %593 = vmatprep.subr.mxu0 %v269_v56  ;;  %671 = vmatprep.subr.mxu1 %v1577_v11  ;;  %v1859_v11 = vsub.f32 %v59_v30, %v1839_v35  ;;  %v1864_v40 = vand.u32 4294901760, %v53_v10 }
  0x4f   :  { %597 = vmatpush1.msra.mxu0 %v275_v57  ;;  %673 = vmatpush1.msra.mxu1 %v1579_v12  ;;  %v836_v12 = vand.u32 4294901760, %v1837_v4 }
  0x50   :  { %601 = vmatprep.subr.mxu0 %v281_v29  ;;  %675 = vmatprep.subr.mxu1 %v1582_v16  ;;  %v1869_v16 = vsub.f32 %v56_v34, %v1850_v6 }
  0x51   :  { %605 = vmatpush1.msra.mxu0 %v287_v21  ;;  %638 = vmatprep.mubr.f32.mxu0 %v1538_v0 }
  0x52   :  { %677 = vmatpush1.msra.mxu1 %v1584_v17  ;;  %640 = vmatmul.mubr.f32.vlgmr.msra.gmra.mxu0 %v1691_v7  ;;  %v837_v17 = vsub.f32 %v1837_v4, %v836_v12  ;;  %v857_v58 = vand.u32 4294901760, %v1869_v16 }
  0x53   :  { %679 = vmatprep.subr.mxu1 %v1586_v18  ;;  %1347 = vmatprep.subr.mxu0 %v1538_v0  ;;  %v850_v18 = vand.u32 4294901760, %v1859_v11 }
  0x54   :  { %681 = vmatpush1.msra.mxu1 %v1596_v23  ;;  %1348 = vmatpush3.msra.mxu0 %v1820_v26  ;;  %v1885_v23 = vsub.f32 %v53_v10, %v1864_v40  ;;  %v858_v3 = vsub.f32 %v1869_v16, %v857_v58 }
  0x55   :  { %683 = vmatprep.subr.mxu1 %v1602_v25  ;;  %1349 = vmatprep.subr.mxu0 %v1538_v0  ;;  %v844_v25 = vsub.f32 %v1848_v5, %v843_v41  ;;  %v851_v63 = vsub.f32 %v1859_v11, %v850_v18 }
  0x56   :  { %685 = vmatpush1.msra.mxu1 %v1616_v31  ;;  %1350 = vmatpush3.msra.mxu0 %v1828_v32  ;;  %v1898_v31 = vsub.f32 %v50_v36, %v1874_v46  ;;  %v864_v2 = vand.u32 4294901760, %v1885_v23  ;;  %v859_v43 = vand.u32 4294901760, %v858_v3 }
  0x57   :  { %687 = vmatprep.subr.mxu1 %v1622_v33  ;;  %1351 = vmatprep.subr.mxu0 %v1538_v0  ;;  %v838_v33 = vand.u32 4294901760, %v837_v17  ;;  %v852_v13 = vand.u32 4294901760, %v851_v63 }
  0x58   :  { %689 = vmatpush1.msra.mxu1 %v1631_v37  ;;  %1352 = vmatpush3.msra.mxu0 %v1839_v35  ;;  %v1910_v37 = vsub.f32 %v47_v45, %v1887_v55  ;;  %v871_v9 = vand.u32 4294901760, %v1898_v31  ;;  %v865_v14 = vsub.f32 %v1885_v23, %v864_v2 }
  0x59   :  { %691 = vmatprep.subr.mxu1 %v1644_v42  ;;  %1353 = vmatprep.subr.mxu0 %v1538_v0  ;;  %v845_v42 = vand.u32 4294901760, %v844_v25 }
  0x5a   :  { %693 = vmatpush1.msra.mxu1 %v1663_v50  ;;  %726 = vmatprep.mubr.f32.mxu1 %v1538_v0  ;;  %v1921_v50 = vsub.f32 %v44_v49, %v1900_v59  ;;  %v878_v22 = vand.u32 4294901760, %v1910_v37  ;;  %v872_v44 = vsub.f32 %v1898_v31, %v871_v9  ;;  %v866_v56 = vand.u32 4294901760, %v865_v14 }
  0x5b   :  { %1354 = vmatpush3.msra.mxu0 %v1850_v6  ;;  %728 = vmatmul.mubr.f32.vlgmr.msra.gmra.mxu1 %v1691_v7 }
  0x5c   :  { %1355 = vmatprep.subr.mxu0 %v1538_v0  ;;  %1366 = vmatprep.subr.mxu1 %v1538_v0  ;;  %v885_v52 = vand.u32 4294901760, %v1921_v50  ;;  %v879_v28 = vsub.f32 %v1910_v37, %v878_v22  ;;  %v873_v57 = vand.u32 4294901760, %v872_v44 }
  0x5d   :  { %1356 = vmatpush3.msra.mxu0 %v1864_v40  ;;  %1367 = vmatpush3.msra.mxu1 %v838_v33 }
  0x5e   :  { %1357 = vmatprep.subr.mxu0 %v1538_v0  ;;  %1368 = vmatprep.subr.mxu1 %v1538_v0  ;;  %v886_v60 = vsub.f32 %v1921_v50, %v885_v52  ;;  %v880_v61 = vand.u32 4294901760, %v879_v28 }
  0x5f   :  { %1358 = vmatpush3.msra.mxu0 %v1874_v46  ;;  %1369 = vmatpush3.msra.mxu1 %v845_v42 }
  0x60   :  { %1359 = vmatprep.subr.mxu0 %v1538_v0  ;;  %1370 = vmatprep.subr.mxu1 %v1538_v0  ;;  %v887_v62 = vand.u32 4294901760, %v886_v60 }
  0x61   :  { %1360 = vmatpush3.msra.mxu0 %v1887_v55  ;;  %1371 = vmatpush3.msra.mxu1 %v852_v13 }
  0x62   :  { %1361 = vmatprep.subr.mxu0 %v1538_v0  ;;  %1372 = vmatprep.subr.mxu1 %v1538_v0 }
  0x63   :  { %1362 = vmatpush3.msra.mxu0 %v1900_v59  ;;  %1373 = vmatpush3.msra.mxu1 %v859_v43 }
  0x64   :  { %1363 = vmatprep.mubr.msk.f32.mxu0 %vm1539_vm1, %v1538_v0  ;;  %1374 = vmatprep.subr.mxu1 %v1538_v0 }
  0x65   :  { %1385 = vmatprep.subr.mxu0 %v1538_v0  ;;  %1364 = vmatmul.mubr.f32.vlgmr.msra.gmra.mxu0 %v1754_v15 }
  0x66   :  { %1375 = vmatpush3.msra.mxu1 %v866_v56  ;;  %1386 = vmatpush3.msra.mxu0 %v1837_v4 }
  0x67   :  { %1376 = vmatprep.subr.mxu1 %v1538_v0  ;;  %1387 = vmatprep.subr.mxu0 %v1538_v0 }
  0x68   :  { %1377 = vmatpush3.msra.mxu1 %v873_v57  ;;  %1388 = vmatpush3.msra.mxu0 %v1848_v5 }
  0x69   :  { %1378 = vmatprep.subr.mxu1 %v1538_v0  ;;  %1389 = vmatprep.subr.mxu0 %v1538_v0 }
  0x6a   :  { %1379 = vmatpush3.msra.mxu1 %v880_v61  ;;  %1390 = vmatpush3.msra.mxu0 %v1859_v11 }
  0x6b   :  { %1380 = vmatprep.subr.mxu1 %v1538_v0  ;;  %1391 = vmatprep.subr.mxu0 %v1538_v0 }
  0x6c   :  { %1381 = vmatpush3.msra.mxu1 %v887_v62  ;;  %1382 = vmatprep.mubr.msk.f32.mxu1 %vm1539_vm1, %v1538_v0 }
  0x6d   :  { %1392 = vmatpush3.msra.mxu0 %v1869_v16  ;;  %1383 = vmatmul.mubr.f32.vlgmr.msra.gmra.mxu1 %v1691_v7 }
  0x6e   :  { %1393 = vmatprep.subr.mxu0 %v1538_v0  ;;  %1404 = vmatprep.subr.mxu1 %v1538_v0 }
  0x6f   :  { %1394 = vmatpush3.msra.mxu0 %v1885_v23  ;;  %1405 = vmatpush3.msra.mxu1 %v1820_v26 }
  0x70   :  { %1395 = vmatprep.subr.mxu0 %v1538_v0  ;;  %1406 = vmatprep.subr.mxu1 %v1538_v0 }
  0x71   :  { %1396 = vmatpush3.msra.mxu0 %v1898_v31  ;;  %1407 = vmatpush3.msra.mxu1 %v1828_v32 }
  0x72   :  { %1397 = vmatprep.subr.mxu0 %v1538_v0  ;;  %1408 = vmatprep.subr.mxu1 %v1538_v0 }
  0x73   :  { %1398 = vmatpush3.msra.mxu0 %v1910_v37  ;;  %1409 = vmatpush3.msra.mxu1 %v1839_v35 }
  0x74   :  { %1399 = vmatprep.subr.mxu0 %v1538_v0  ;;  %1410 = vmatprep.subr.mxu1 %v1538_v0 }
  0x75   :  { %1400 = vmatpush3.msra.mxu0 %v1921_v50  ;;  %1401 = vmatprep.mubr.msk.f32.mxu0 %vm1539_vm1, %v1538_v0 }
  0x76   :  { %1411 = vmatpush3.msra.mxu1 %v1850_v6  ;;  %1402 = vmatmul.mubr.f32.vlgmr.msra.gmra.mxu0 %v1711_v39  ;;  %v68_v39 = vlaneseq }
  0x77   :  { %1412 = vmatprep.subr.mxu1 %v1538_v0  ;;  %1423 = vmatprep.subr.mxu0 %v1538_v0 }
  0x78   :  { %1413 = vmatpush3.msra.mxu1 %v1864_v40  ;;  %1424 = vmatpush3.msra.mxu0 %v836_v12 }
  0x79   :  { %1414 = vmatprep.subr.mxu1 %v1538_v0  ;;  %1425 = vmatprep.subr.mxu0 %v1538_v0 }
  0x7a   :  { %1415 = vmatpush3.msra.mxu1 %v1874_v46  ;;  %1426 = vmatpush3.msra.mxu0 %v843_v41 }
  0x7b   :  { %1416 = vmatprep.subr.mxu1 %v1538_v0  ;;  %1427 = vmatprep.subr.mxu0 %v1538_v0 }
  0x7c   :  { %1417 = vmatpush3.msra.mxu1 %v1887_v55  ;;  %1428 = vmatpush3.msra.mxu0 %v850_v18 }
  0x7d   :  { %1418 = vmatprep.subr.mxu1 %v1538_v0  ;;  %1429 = vmatprep.subr.mxu0 %v1538_v0 }
  0x7e   :  { %1419 = vmatpush3.msra.mxu1 %v1900_v59  ;;  %1420 = vmatprep.mubr.msk.f32.mxu1 %vm1539_vm1, %v1538_v0 }
  0x7f   :  { %1430 = vmatpush3.msra.mxu0 %v857_v58  ;;  %1421 = vmatmul.mubr.f32.vlgmr.msra.gmra.mxu1 %v1725_v51  ;;  %v69_v51 = vshrl.u32 %v68_v39, 7 }
  0x80   :  { %1431 = vmatprep.subr.mxu0 %v1538_v0  ;;  %1442 = vmatprep.subr.mxu1 %v1538_v0 }
  0x81   :  { %1432 = vmatpush3.msra.mxu0 %v864_v2  ;;  %1443 = vmatpush3.msra.mxu1 %v1820_v26  ;;  %v70_v8 = vsub.s32 0, %v69_v51  ;;  %v74_v15 = vsub.s32 1, %v69_v51  ;;  %v78_v23 = vsub.s32 2, %v69_v51 }
  0x82   :  { %1433 = vmatprep.subr.mxu0 %v1538_v0  ;;  %1444 = vmatprep.subr.mxu1 %v1538_v0 }
  0x83   :  { %1434 = vmatpush3.msra.mxu0 %v871_v9  ;;  %1445 = vmatpush3.msra.mxu1 %v1828_v32  ;;  %v71_v38 = vrot.slane %v66_v20, %v70_v8  ;;  %v75_v47 = vrot.slane %v66_v20, %v74_v15  ;;  %v79_v58 = vrot.slane %v66_v20, %v78_v23 }
  0x84   :  { %1435 = vmatprep.subr.mxu0 %v1538_v0  ;;  %1446 = vmatprep.subr.mxu1 %v1538_v0 }
  0x85   :  { %1436 = vmatpush3.msra.mxu0 %v878_v22  ;;  %1447 = vmatpush3.msra.mxu1 %v1839_v35 }
  0x86   :  { %1437 = vmatprep.subr.mxu0 %v1538_v0  ;;  %1448 = vmatprep.subr.mxu1 %v1538_v0 }
  0x87   :  { %1438 = vmatpush3.msra.mxu0 %v885_v52  ;;  %1439 = vmatprep.mubr.msk.f32.mxu0 %vm1539_vm1, %v1538_v0 }
  0x88   :  { %1449 = vmatpush3.msra.mxu1 %v1850_v6  ;;  %1440 = vmatmul.mubr.f32.vlgmr.msra.gmra.mxu0 %v1691_v7 }
  0x89   :  { %1450 = vmatprep.subr.mxu1 %v1538_v0  ;;  %1458 = vmatprep.mubr.msk.f32.mxu1 %vm1539_vm1, %v1538_v0 }
  0x8a   :  { %1451 = vmatpush3.msra.mxu1 %v1864_v40 }
  0x8b   :  { %1452 = vmatprep.subr.mxu1 %v1538_v0 }
  0x8c   :  { %1453 = vmatpush3.msra.mxu1 %v1874_v46 }
  0x8d   :  { %1454 = vmatprep.subr.mxu1 %v1538_v0 }
  0x8e   :  { %1455 = vmatpush3.msra.mxu1 %v1887_v55 }
  0x8f   :  { %1456 = vmatprep.subr.mxu1 %v1538_v0 }
  0x90   :  { %1457 = vmatpush3.msra.mxu1 %v1900_v59 }
  0x91   :  { %1459 = vmatmul.mubr.f32.vlgmr.msra.gmra.mxu1 %v1691_v7 }
  0xf1   :  { %v174_v1 = vpop.f32.mrf.mxu0 }
  0xf2   :  { %v175_v0 = vadd.f32 %v174_v1, %v71_v38 }
  0xf3   :  { %v176_v29 = vpop.f32.mrf.mxu0 }
  0xf4   :  { %v177_v27 = vadd.f32 %v176_v29, %v75_v47 }
  0xf7   :  { %v326_v21 = vpop.f32.mrf.mxu1 }
  0xf8   :  { %v327_v24 = vadd.f32 %v326_v21, %v175_v0 }
  0xf9   :  { %v328_v53 = vpop.f32.mrf.mxu1 }
  0xfa   :  { %v329_v26 = vadd.f32 %v328_v53, %v177_v27 }
 0x101   :  { %v431_v48 = vpop.f32.mrf.mxu0 }
 0x102   :  { %v432_v32 = vadd.f32 %v431_v48, %v327_v24 }
 0x103   :  { %v433_v54 = vpop.f32.mrf.mxu0 }
 0x104   :  { %v434_v34 = vadd.f32 %v433_v54, %v329_v26 }
 0x109   :  { %v521_v19 = vpop.f32.mrf.mxu1 }
 0x10a   :  { %v522_v35 = vadd.f32 %v521_v19, %v432_v32 }
 0x10b   :  { %v523_v30 = vpop.f32.mrf.mxu1 }
 0x10c   :  { %v524_v5 = vadd.f32 %v523_v30, %v434_v34 }
 0x112   :  { %v641_v7 = vpop.f32.mrf.mxu0 }
 0x113   :  { %v642_v10 = vadd.f32 %v641_v7, %v522_v35 }
 0x114   :  { %v643_v4 = vpop.f32.mrf.mxu0 }
 0x115   :  { %v644_v11 = vadd.f32 %v643_v4, %v524_v5 }
 0x11b   :  { %v729_v6 = vpop.f32.mrf.mxu1 }
 0x11c   :  { %v730_v36 = vadd.f32 %v729_v6, %v642_v10 }
 0x11d   :  { %v731_v12 = vpop.f32.mrf.mxu1 }
 0x11e   :  { %v732_v40 = vadd.f32 %v731_v12, %v644_v11 }
 0x120   :  { %v1273_v16 = vcombine.low %v730_v36, %v732_v40 }
 0x122   :  { %1275 = vst [vmem:[#allocation7] sm:$0xff] %v1273_v16 }
 0x125   :  { %v813_v41 = vpop.f32.mrf.mxu0 }
 0x126   :  { %v814_v31 = vadd.f32 %v813_v41, %v79_v58 }
 0x127   :  { %v1365_v45 = vpop.f32.mrf.mxu0 }
 0x12d   :  { %v924_v46 = vpop.f32.mrf.mxu1 }
 0x12e   :  { %v925_v33 = vadd.f32 %v924_v46, %v814_v31 }
 0x12f   :  { %v1384_v17 = vpop.f32.mrf.mxu1 }
 0x136   :  { %v1012_v18 = vpop.f32.mrf.mxu0 }
 0x137   :  { %v1013_v37 = vadd.f32 %v1012_v18, %v925_v33 }
 0x138   :  { %v1403_v49 = vpop.f32.mrf.mxu0 }
 0x13f   :  { %v1093_v55 = vpop.f32.mrf.mxu1 }
 0x140   :  { %v1094_v2 = vadd.f32 %v1093_v55, %v1013_v37 }
 0x141   :  { %v1422_v25 = vpop.f32.mrf.mxu1 }
 0x148   :  { %v1188_v59 = vpop.f32.mrf.mxu0 }
 0x149   :  { %v1189_v42 = vadd.f32 %v1188_v59, %v1094_v2 }
 0x14a   :  { %v1441_v63 = vpop.f32.mrf.mxu0 }
 0x151   :  { %v1267_v3 = vpop.f32.mrf.mxu1 }
 0x152   :  { %v1268_v50 = vadd.f32 %v1267_v3, %v1189_v42 }
 0x153   :  { %v1460_v9 = vpop.f32.mrf.mxu1 }
 0x154   :  { %1276 = vst [vmem:[#allocation7 + $0x8] sm:$0xf] %v1268_v50 }
 0x155   :  { %1519 = shalt.err (!%p1516_p0)
}
 0x156   :  { %1286 = dma.vmem_to_hbm [thread:$0]  %s1284_s24, 192, %s2051_s3, [#allocation4]  }
 0x157   :  { %1532 = dma.done.wait [#allocation4], 192  }
 0x158   :  { %1533 = vsyncadd [#allocation4], 4294967104 }
 0x159   :  { %1290 = vsyncpa [#allocation3], 1 }
 0x15a   :  { %1291 = vsyncpa [#allocation6], 1 }
 0x15b   :  { %1292 = vsyncpa [#allocation4], 1 }

</bundles_post_ra>
